<compile_context>
chip_gen: v7x
topology: tpu7x:2x2x1
jax: 0.10.0
libtpu: 0.0.40
codegen_flags: <defaults>
</compile_context>

<pallas_src>
import functools
import math

import jax
import jax.numpy as jnp
from jax.experimental import pallas as pl
from jax.experimental.pallas import tpu as pltpu


def _attn_heads_kernel(q_ref, k_ref, v_ref, w_ref, b_ref, o_ref, kp_ref, vp_ref, *,
                       num_heads, head_dim, compute_dtype, approx_recip):
    """Fused multi-head AttnHead forward.

    q_ref: (tq, dim)        k_ref/v_ref: (Sk, dim)     (all already in compute_dtype)
    w_ref: (3, dim, H*hd)   stacked [Wq, Wk, Wv], compute_dtype
    b_ref: (3, H*hd)        stacked [bq, bk, bv], f32
    o_ref: (tq, H*hd)       lane-dense output slab
    kp_ref/vp_ref: (Sk, H*hd) persistent VMEM scratch with the projected K / V
    """
    cd = compute_dtype
    f32 = jnp.float32

    b = b_ref[...].astype(f32)  # (3, H*hd)

    # ---- K/V projections: grid-invariant, compute once into persistent scratch. ----
    @pl.when(pl.program_id(0) == 0)
    def _project_kv():
        k = jnp.dot(k_ref[...], w_ref[1], preferred_element_type=f32) + b[1:2, :]
        v = jnp.dot(v_ref[...], w_ref[2], preferred_element_type=f32) + b[2:3, :]
        kp_ref[...] = k.astype(kp_ref.dtype)
        vp_ref[...] = v.astype(vp_ref.dtype)

    # ---- Per-tile Q projection: one wide, lane-dense MXU matmul, f32 accumulation. ----
    q = jnp.dot(q_ref[...], w_ref[0], preferred_element_type=f32) + b[0:1, :]

    scale = 1.0 / math.sqrt(float(head_dim))  # sdpa scales by sqrt(projected q width)
    dn_qk = (((1,), (1,)), ((), ()))          # contract last dims: q @ k^T without .T

    # ---- Per-head attention.  All per-head stores are deferred: results are collected
    # and written once as a dense (tq, H*hd) slab (no masked 16-lane partial stores). ----
    outs = []
    for h in range(num_heads):
        sl = slice(h * head_dim, (h + 1) * head_dim)
        qh = q[:, sl].astype(cd)
        kh = kp_ref[:, sl]                    # already compute_dtype
        vh = vp_ref[:, sl]

        s = jax.lax.dot_general(qh, kh, dn_qk, preferred_element_type=f32) * scale

        # Softmax over keys, all in f32 (v5e-safe; exp on EUP).
        m = jnp.max(s, axis=-1, keepdims=True)
        e = jnp.exp(s - m)
        denom = jnp.sum(e, axis=-1, keepdims=True)

        # Unnormalized P@V, then fold the 1/denom onto the small (tq, hd) result.
        oh = jnp.dot(e.astype(cd), vh, preferred_element_type=f32)
        outs.append(oh * pl.reciprocal(denom, approx=approx_recip))

    o_ref[...] = jnp.concatenate(outs, axis=-1).astype(o_ref.dtype)


def fused_attn_heads(query, key, value, w_stack, b_stack, *,
                     num_heads, head_dim, compute_dtype=jnp.bfloat16,
                     out_dtype=jnp.float32, q_block=256):
    """Run H fused AttnHead forwards in one pallas_call.

    query: (Sq, dim), key/value: (Sk, dim)
    w_stack: (3, dim, H*head_dim), b_stack: (3, H*head_dim)
    returns (Sq, H*head_dim); column block h is head h's output.
    """
    Sq, dim = query.shape
    Sk = key.shape[0]
    hd_total = num_heads * head_dim
    assert w_stack.shape == (3, dim, hd_total), w_stack.shape
    assert b_stack.shape == (3, hd_total), b_stack.shape

    # Ship MXU operands already in compute_dtype (halves HBM->VMEM bytes for Q/K/V/W on
    # the bf16 path; valid on v5e as well since only MXU operands are bf16).  Biases stay
    # f32 (added onto the f32 accumulator in-kernel).
    cd = jnp.dtype(compute_dtype)
    query = query.astype(cd)
    key = key.astype(cd)
    value = value.astype(cd)
    w_stack = w_stack.astype(cd)
    b_stack = b_stack.astype(jnp.float32)

    tq = min(q_block, Sq)
    assert Sq % tq == 0, "query length must be divisible by the query tile"
    grid = (Sq // tq,)

    kernel = functools.partial(
        _attn_heads_kernel,
        num_heads=num_heads,
        head_dim=head_dim,
        compute_dtype=cd,
        # Exact reciprocal on the f32 path (tight check); EUP approx on the bf16 path.
        approx_recip=(cd != jnp.dtype(jnp.float32)),
    )

    # Advisory cost estimate (projections counted once, dtype-aware bytes).
    flops = (2 * dim * hd_total * (Sq + 2 * Sk)      # Q + K + V projections
             + 4 * Sq * Sk * hd_total)               # scores + P@V
    transcendentals = num_heads * Sq * Sk + num_heads * Sq
    bytes_accessed = (cd.itemsize * (query.size + key.size + value.size + w_stack.size)
                      + 4 * b_stack.size
                      + jnp.dtype(out_dtype).itemsize * Sq * hd_total)

    return pl.pallas_call(
        kernel,
        out_shape=jax.ShapeDtypeStruct((Sq, hd_total), out_dtype),
        grid=grid,
        in_specs=[
            pl.BlockSpec((tq, dim), lambda i: (i, 0)),               # query tile
            pl.BlockSpec((Sk, dim), lambda i: (0, 0)),               # full key (invariant)
            pl.BlockSpec((Sk, dim), lambda i: (0, 0)),               # full value (invariant)
            pl.BlockSpec((3, dim, hd_total), lambda i: (0, 0, 0)),   # stacked weights
            pl.BlockSpec((3, hd_total), lambda i: (0, 0)),           # stacked biases
        ],
        out_specs=pl.BlockSpec((tq, hd_total), lambda i: (i, 0)),
        scratch_shapes=[
            pltpu.VMEM((Sk, hd_total), cd),   # projected K (persists across query tiles)
            pltpu.VMEM((Sk, hd_total), cd),   # projected V (persists across query tiles)
        ],
        # "arbitrary": the pl.when(i==0) K/V projection + persistent scratch requires
        # sequential grid execution (cannot shard this axis across v7x's 2 TCs).
        compiler_params=pltpu.CompilerParams(
            dimension_semantics=("arbitrary",)),
        cost_estimate=pl.CostEstimate(
            flops=int(flops),
            transcendentals=int(transcendentals),
            bytes_accessed=int(bytes_accessed)),
    )(query, key, value, w_stack, b_stack)


# ----------------------------------------------------------------------------- helpers

def attn_head_ref(query, key, value, params):
    """Pure-JAX single-head reference (mirrors the PyTorch module exactly)."""
    wq, bq, wk, bk, wv, bv = params
    q = query @ wq + bq
    k = key @ wk + bk
    v = value @ wv + bv
    score = (q @ k.T) / math.sqrt(q.shape[-1])
    p = jax.nn.softmax(score, axis=-1)   # torch softmax(dim=1) == last axis for 2-D
    return p @ v


def make_head_params(key, dim, dim_q, dim_k, dim_v):
    """One AttnHead's parameters; weights stored as (in, out) = torch_W.T."""
    dim_v = dim_k  # the module overrides dim_v = dim_k
    ks = jax.random.split(key, 6)
    s = 1.0 / math.sqrt(dim)
    wq = jax.random.uniform(ks[0], (dim, dim_q), jnp.float32, -s, s)
    bq = jax.random.uniform(ks[1], (dim_q,), jnp.float32, -s, s)
    wk = jax.random.uniform(ks[2], (dim, dim_k), jnp.float32, -s, s)
    bk = jax.random.uniform(ks[3], (dim_k,), jnp.float32, -s, s)
    wv = jax.random.uniform(ks[4], (dim, dim_v), jnp.float32, -s, s)
    bv = jax.random.uniform(ks[5], (dim_v,), jnp.float32, -s, s)
    return (wq, bq, wk, bk, wv, bv)


def pack_heads(head_params):
    """Stack H heads' params into the fused (3, dim, H*hd) / (3, H*hd) layout."""
    wq = jnp.concatenate([p[0] for p in head_params], axis=1)
    wk = jnp.concatenate([p[2] for p in head_params], axis=1)
    wv = jnp.concatenate([p[4] for p in head_params], axis=1)
    bq = jnp.concatenate([p[1] for p in head_params], axis=0)
    bk = jnp.concatenate([p[3] for p in head_params], axis=0)
    bv = jnp.concatenate([p[5] for p in head_params], axis=0)
    w_stack = jnp.stack([wq, wk, wv], axis=0)   # (3, dim, H*hd)
    b_stack = jnp.stack([bq, bk, bv], axis=0)   # (3, H*hd)
    return w_stack, b_stack


if __name__ == "__main__":
    # Module-consistent toy shapes: hidden dim=32, dim_q=dim_k=16 (dim_v forced to dim_k),
    # Sq=Sk=8.  H=8 heads are fused so the output slab is (8, 128) = lane-dense.
    dim, dim_q, dim_k, dim_v = 32, 16, 16, 64
    head_dim = dim_k
    H = 8
    Sq, Sk = 8, 8

    root = jax.random.PRNGKey(0)
    k_heads, k_q, k_k, k_v = jax.random.split(root, 4)
    head_keys = jax.random.split(k_heads, H)
    head_params = [make_head_params(hk, dim, dim_q, dim_k, dim_v) for hk in head_keys]

    query = jax.random.normal(k_q, (Sq, dim), jnp.float32)
    key = jax.random.normal(k_k, (Sk, dim), jnp.float32)
    value = jax.random.normal(k_v, (Sk, dim), jnp.float32)

    refs = [attn_head_ref(query, key, value, p) for p in head_params]
    ref_fused = jnp.concatenate(refs, axis=1)           # (Sq, H*head_dim)

    # 1) Single head (the module as-is), f32 matmuls, tight check.
    w1, b1 = pack_heads(head_params[:1])
    out1 = fused_attn_heads(query, key, value, w1, b1,
                            num_heads=1, head_dim=head_dim,
                            compute_dtype=jnp.float32)
    jax.block_until_ready(out1)
    assert out1.shape == (Sq, head_dim), out1.shape
    assert jnp.allclose(out1, refs[0], atol=1e-5, rtol=1e-5), "single-head f32 mismatch"

    # 2) H heads fused into one lane-dense call, f32 matmuls, tight check.
    w_stack, b_stack = pack_heads(head_params)
    out_f32 = fused_attn_heads(query, key, value, w_stack, b_stack,
                               num_heads=H, head_dim=head_dim,
                               compute_dtype=jnp.float32)
    jax.block_until_ready(out_f32)
    assert out_f32.shape == (Sq, H * head_dim), out_f32.shape
    assert jnp.allclose(out_f32, ref_fused, atol=1e-5, rtol=1e-5), "fused f32 mismatch"

    # 3) Same, bf16 MXU operands DMA'd from HBM / f32 accumulation & softmax,
    #    looser tolerance.  (Also valid on v5e: only MXU operands are bf16.)
    out_bf16 = fused_attn_heads(query, key, value, w_stack, b_stack,
                                num_heads=H, head_dim=head_dim,
                                compute_dtype=jnp.bfloat16)
    jax.block_until_ready(out_bf16)
    assert jnp.allclose(out_bf16, ref_fused, atol=2e-2, rtol=2e-2), "fused bf16 mismatch"

    print("KERNEL_OK")
</pallas_src>

<mosaic_0001>
module attributes {stable_mosaic.version = 11 : i64} {
  func.func @_attn_heads_kernel(%arg0: i32, %arg1: memref<8x32xf32, #tpu.memory_space<vmem>>, %arg2: memref<8x32xf32, #tpu.memory_space<vmem>>, %arg3: memref<8x32xf32, #tpu.memory_space<vmem>>, %arg4: memref<3x32x16xf32, #tpu.memory_space<vmem>>, %arg5: memref<3x16xf32, #tpu.memory_space<vmem>>, %arg6: memref<8x16xf32, #tpu.memory_space<vmem>>, %arg7: memref<8x16xf32, #tpu.memory_space<vmem>>, %arg8: memref<8x16xf32, #tpu.memory_space<vmem>>) attributes {dimension_semantics = [#tpu.dimension_semantics<arbitrary>], iteration_bounds = array<i64: 1>, scalar_prefetch = 0 : i64, scratch_operands = 2 : i64, tpu.core_type = #tpu.core_type<tc>, window_params = [{transform_indices = @transform_0, window_bounds = array<i64: 8, 32>}, {pipeline_mode = #tpu.pipeline_mode<synchronous>, transform_indices = @transform_1, window_bounds = array<i64: 8, 32>}, {pipeline_mode = #tpu.pipeline_mode<synchronous>, transform_indices = @transform_2, window_bounds = array<i64: 8, 32>}, {pipeline_mode = #tpu.pipeline_mode<synchronous>, transform_indices = @transform_3, window_bounds = array<i64: 3, 32, 16>}, {pipeline_mode = #tpu.pipeline_mode<synchronous>, transform_indices = @transform_4, window_bounds = array<i64: 3, 16>}, {transform_indices = @transform_5, window_bounds = array<i64: 8, 16>}]} {
    %c0 = arith.constant 0 : index
    %c0_0 = arith.constant 0 : index
    %0 = vector.load %arg5[%c0, %c0_0] : memref<3x16xf32, #tpu.memory_space<vmem>>, vector<3x16xf32>
    %c0_i32 = arith.constant 0 : i32
    %1 = arith.cmpi eq, %arg0, %c0_i32 : i32
    %2 = arith.extui %1 : i1 to i32
    %c0_i32_1 = arith.constant 0 : i32
    %3 = arith.cmpi ne, %2, %c0_i32_1 : i32
    scf.if %3 {
      %c0_18 = arith.constant 0 : index
      %c0_19 = arith.constant 0 : index
      %28 = vector.load %arg2[%c0_18, %c0_19] : memref<8x32xf32, #tpu.memory_space<vmem>>, vector<8x32xf32>
      %c1 = arith.constant 1 : index
      %c0_20 = arith.constant 0 : index
      %c0_21 = arith.constant 0 : index
      %29 = vector.load %arg4[%c1, %c0_20, %c0_21] : memref<3x32x16xf32, #tpu.memory_space<vmem>>, vector<1x32x16xf32>
      %30 = vector.shape_cast %29 : vector<1x32x16xf32> to vector<32x16xf32>
      %cst_22 = arith.constant dense<0.000000e+00> : vector<8x16xf32>
      %31 = tpu.matmul %28, %30, %cst_22 {dimension_numbers = #tpu.dot_dimension_numbers<[1], [0], [0], [1], [0, 0, 1, 1], [], []>} : vector<8x32xf32>, vector<32x16xf32>, vector<8x16xf32> -> vector<8x16xf32>
      %32 = vector.extract_strided_slice %0 {offsets = [1, 0], sizes = [1, 16], strides = [1, 1]} : vector<3x16xf32> to vector<1x16xf32>
      %33 = vector.broadcast %32 : vector<1x16xf32> to vector<8x16xf32>
      %34 = arith.addf %31, %33 : vector<8x16xf32>
      %c0_23 = arith.constant 0 : index
      %c0_24 = arith.constant 0 : index
      %35 = vector.load %arg3[%c0_23, %c0_24] : memref<8x32xf32, #tpu.memory_space<vmem>>, vector<8x32xf32>
      %c2 = arith.constant 2 : index
      %c0_25 = arith.constant 0 : index
      %c0_26 = arith.constant 0 : index
      %36 = vector.load %arg4[%c2, %c0_25, %c0_26] : memref<3x32x16xf32, #tpu.memory_space<vmem>>, vector<1x32x16xf32>
      %37 = vector.shape_cast %36 : vector<1x32x16xf32> to vector<32x16xf32>
      %cst_27 = arith.constant dense<0.000000e+00> : vector<8x16xf32>
      %38 = tpu.matmul %35, %37, %cst_27 {dimension_numbers = #tpu.dot_dimension_numbers<[1], [0], [0], [1], [0, 0, 1, 1], [], []>} : vector<8x32xf32>, vector<32x16xf32>, vector<8x16xf32> -> vector<8x16xf32>
      %39 = vector.extract_strided_slice %0 {offsets = [2, 0], sizes = [1, 16], strides = [1, 1]} : vector<3x16xf32> to vector<1x16xf32>
      %40 = vector.broadcast %39 : vector<1x16xf32> to vector<8x16xf32>
      %41 = arith.addf %38, %40 : vector<8x16xf32>
      %c0_28 = arith.constant 0 : index
      %c0_29 = arith.constant 0 : index
      %42 = vector.load %arg7[%c0_28, %c0_29] : memref<8x16xf32, #tpu.memory_space<vmem>>, vector<8x16xf32>
      tpu.vector_store %arg7[%c0_28, %c0_29], %34 {strides = array<i32>} : memref<8x16xf32, #tpu.memory_space<vmem>>, vector<8x16xf32>,
      %c0_30 = arith.constant 0 : index
      %c0_31 = arith.constant 0 : index
      %43 = vector.load %arg8[%c0_30, %c0_31] : memref<8x16xf32, #tpu.memory_space<vmem>>, vector<8x16xf32>
      tpu.vector_store %arg8[%c0_30, %c0_31], %41 {strides = array<i32>} : memref<8x16xf32, #tpu.memory_space<vmem>>, vector<8x16xf32>,
    } else {
    }
    %c0_2 = arith.constant 0 : index
    %c0_3 = arith.constant 0 : index
    %4 = vector.load %arg1[%c0_2, %c0_3] : memref<8x32xf32, #tpu.memory_space<vmem>>, vector<8x32xf32>
    %c0_4 = arith.constant 0 : index
    %c0_5 = arith.constant 0 : index
    %c0_6 = arith.constant 0 : index
    %5 = vector.load %arg4[%c0_4, %c0_5, %c0_6] : memref<3x32x16xf32, #tpu.memory_space<vmem>>, vector<1x32x16xf32>
    %6 = vector.shape_cast %5 : vector<1x32x16xf32> to vector<32x16xf32>
    %cst = arith.constant dense<0.000000e+00> : vector<8x16xf32>
    %7 = tpu.matmul %4, %6, %cst {dimension_numbers = #tpu.dot_dimension_numbers<[1], [0], [0], [1], [0, 0, 1, 1], [], []>} : vector<8x32xf32>, vector<32x16xf32>, vector<8x16xf32> -> vector<8x16xf32>
    %8 = vector.extract_strided_slice %0 {offsets = [0, 0], sizes = [1, 16], strides = [1, 1]} : vector<3x16xf32> to vector<1x16xf32>
    %9 = vector.broadcast %8 : vector<1x16xf32> to vector<8x16xf32>
    %10 = arith.addf %7, %9 : vector<8x16xf32>
    %c0_7 = arith.constant 0 : index
    %c0_8 = arith.constant 0 : index
    %11 = vector.load %arg7[%c0_7, %c0_8] : memref<8x16xf32, #tpu.memory_space<vmem>>, vector<8x16xf32>
    %c0_9 = arith.constant 0 : index
    %c0_10 = arith.constant 0 : index
    %12 = vector.load %arg8[%c0_9, %c0_10] : memref<8x16xf32, #tpu.memory_space<vmem>>, vector<8x16xf32>
    %cst_11 = arith.constant dense<0.000000e+00> : vector<8x8xf32>
    %13 = tpu.matmul %10, %11, %cst_11 {dimension_numbers = #tpu.dot_dimension_numbers<[1], [1], [0], [0], [0, 0, 1, 0], [], []>} : vector<8x16xf32>, vector<8x16xf32>, vector<8x8xf32> -> vector<8x8xf32>
    %cst_12 = arith.constant 2.500000e-01 : f32
    %14 = vector.broadcast %cst_12 : f32 to vector<8x8xf32>
    %15 = arith.mulf %13, %14 : vector<8x8xf32>
    %cst_13 = arith.constant dense<0xFF800000> : vector<8xf32>
    %16 = vector.multi_reduction <maximumf>, %15, %cst_13 [1] : vector<8x8xf32> to vector<8xf32>
    %17 = vector.shape_cast %16 : vector<8xf32> to vector<8x1xf32>
    %18 = vector.broadcast %17 : vector<8x1xf32> to vector<8x8xf32>
    %19 = arith.subf %15, %18 : vector<8x8xf32>
    %20 = math.exp %19 : vector<8x8xf32>
    %cst_14 = arith.constant dense<0.000000e+00> : vector<8xf32>
    %21 = vector.multi_reduction <add>, %20, %cst_14 [1] : vector<8x8xf32> to vector<8xf32>
    %22 = vector.shape_cast %21 : vector<8xf32> to vector<8x1xf32>
    %cst_15 = arith.constant dense<0.000000e+00> : vector<8x16xf32>
    %23 = tpu.matmul %20, %12, %cst_15 {dimension_numbers = #tpu.dot_dimension_numbers<[1], [0], [0], [1], [0, 0, 1, 1], [], []>} : vector<8x8xf32>, vector<8x16xf32>, vector<8x16xf32> -> vector<8x16xf32>
    %24 = tpu.reciprocal %22 : vector<8x1xf32> -> vector<8x1xf32>
    %25 = vector.broadcast %24 : vector<8x1xf32> to vector<8x16xf32>
    %26 = arith.mulf %23, %25 : vector<8x16xf32>
    %c0_16 = arith.constant 0 : index
    %c0_17 = arith.constant 0 : index
    %27 = vector.load %arg6[%c0_16, %c0_17] : memref<8x16xf32, #tpu.memory_space<vmem>>, vector<8x16xf32>
    tpu.vector_store %arg6[%c0_16, %c0_17], %26 {strides = array<i32>} : memref<8x16xf32, #tpu.memory_space<vmem>>, vector<8x16xf32>,
    return
  }
  func.func @transform_0(%arg0: i32) -> (i32, i32) {
    %c0_i32 = arith.constant 0 : i32
    %c0_i32_0 = arith.constant 0 : i32
    return %arg0, %c0_i32 : i32, i32
  }
  func.func @transform_1(%arg0: i32) -> (i32, i32) {
    %c0_i32 = arith.constant 0 : i32
    %c0_i32_0 = arith.constant 0 : i32
    %c0_i32_1 = arith.constant 0 : i32
    return %c0_i32, %c0_i32_0 : i32, i32
  }
  func.func @transform_2(%arg0: i32) -> (i32, i32) {
    %c0_i32 = arith.constant 0 : i32
    %c0_i32_0 = arith.constant 0 : i32
    %c0_i32_1 = arith.constant 0 : i32
    return %c0_i32, %c0_i32_0 : i32, i32
  }
  func.func @transform_3(%arg0: i32) -> (i32, i32, i32) {
    %c0_i32 = arith.constant 0 : i32
    %c0_i32_0 = arith.constant 0 : i32
    %c0_i32_1 = arith.constant 0 : i32
    %c0_i32_2 = arith.constant 0 : i32
    return %c0_i32, %c0_i32_0, %c0_i32_1 : i32, i32, i32
  }
  func.func @transform_4(%arg0: i32) -> (i32, i32) {
    %c0_i32 = arith.constant 0 : i32
    %c0_i32_0 = arith.constant 0 : i32
    %c0_i32_1 = arith.constant 0 : i32
    return %c0_i32, %c0_i32_0 : i32, i32
  }
  func.func @transform_5(%arg0: i32) -> (i32, i32) {
    %c0_i32 = arith.constant 0 : i32
    %c0_i32_0 = arith.constant 0 : i32
    return %arg0, %c0_i32 : i32, i32
  }
}

</mosaic_0001>

<bundles_post_ra>
// kernel: tpu_custom_call.1
= control target key start
LH: loop header
LB: loop body
LE: loop exit
PB: predicated region body
PF: predicated region fallthrough
CT: control target
= control target key end

     0   :  { %v585_v3 = vmov 0.0|0.0   ;;  %vm586_vm0 = vmmov 0   ;;  %v587_v6 = vmov 0.0   ;;  %s692_s0 = inlined_call_operand.vmem [shape: f32[8,32], index: 0, kind: input, shape index: {}]   ;;  %s693_s1 = inlined_call_operand.vmem [shape: f32[8,32], index: 1, kind: input, shape index: {}]   ;;  %s694_s2 = inlined_call_operand.vmem [shape: f32[8,32], index: 2, kind: input, shape index: {}]   ;;  %s695_s3 = inlined_call_operand.vmem [shape: f32[3,32,16], index: 3, kind: input, shape index: {}]   ;;  %s696_s4 = inlined_call_operand.vmem [shape: f32[3,16], index: 4, kind: input, shape index: {}]   ;;  %s697_s5 = inlined_call_operand.hbm [shape: f32[8,16], index: 5, kind: output, shape index: {}]  }
   0x1   :  { %v459_v0 = vld [vmem:[%s695_s3 + $0x20] sm:$0xff]  ;;  %v460_v1 = vld [vmem:[%s695_s3 + $0x28] sm:$0xff]  ;;  %v461_v2 = vld [vmem:[%s695_s3 + $0x30] sm:$0xff]  ;;  %535 = vmatprep.subr.bf16.mxu0 %v585_v3  ;;  %500 = vmatprep.mubr.msk.f32.mxu0 %vm586_vm0, %v587_v6 }
   0x2   :  { %v536_v4 = vpack.c.bf16 %v460_v1, %v459_v0  ;;  %v462_v5 = vld [vmem:[%s695_s3 + $0x38] sm:$0xff]  ;;  %541 = vmatprep.subr.bf16.mxu1 %v585_v3  ;;  %511 = vmatprep.mubr.msk.f32.mxu1 %vm586_vm0, %v587_v6  ;;  %v464_v8 = vld [vmem:[%s695_s3 + $0x40] sm:$0xff]  ;;  %v465_v9 = vld [vmem:[%s695_s3 + $0x48] sm:$0xff] }
   0x3   :  { %v539_v7 = vpack.c.bf16 %v462_v5, %v461_v2  ;;  %v197_v10 = vld [vmem:[%s695_s3] sm:$0xff]  ;;  %v198_v11 = vld [vmem:[%s695_s3 + $0x8] sm:$0xff]  ;;  %v542_v12 = vpack.c.bf16 %v465_v9, %v464_v8 }
   0x4   :  { %537 = vmatpush3.bf16.msra.mxu0 %v536_v4 }
   0x5   :  { %538 = vmatprep.subr.bf16.mxu0 %v585_v3 }
   0x6   :  { %10 = vsyncpa [#allocation5], 0  ;;  %543 = vmatpush3.bf16.msra.mxu1 %v542_v12  ;;  %v26_v13 = vld [vmem:[%s693_s1] sm:$0xff]  ;;  %vm36_vm1 = vcmask 261120   ;;  %v548_v14 = vpack.c.bf16 %v198_v11, %v197_v10  ;;  %v199_v15 = vld [vmem:[%s695_s3 + $0x10] sm:$0xff]  ;;  %v32_v23 = vlaneseq  ;;  %vm193_vm2 = vcmask 130048  }
   0x7   :  { %544 = vmatprep.subr.bf16.mxu1 %v585_v3  ;;  %v200_v16 = vld [vmem:[%s695_s3 + $0x18] sm:$0xff]  ;;  %v196_v18 = vld [vmem:[%s692_s0] sm:$0xff]  ;;  %v466_v19 = vld [vmem:[%s695_s3 + $0x50] sm:$0xff]  ;;  %vm359_vm3 = vcmask 64512  }
   0x8   :  { %540 = vmatpush3.bf16.msra.mxu0 %v539_v7  ;;  %v551_v17 = vpack.c.bf16 %v200_v16, %v199_v15  ;;  %v467_v20 = vld [vmem:[%s695_s3 + $0x58] sm:$0xff]  ;;  %v110_v22 = vld [vmem:[%s694_s2] sm:$0xff]  ;;  %v33_v24 = vshrl.u32 %v32_v23, 7  ;;  %s588_s2 = smov [#allocation4]  }
   0x9   :  { %547 = vmatprep.subr.bf16.mxu0 %v585_v3  ;;  %v545_v21 = vpack.c.bf16 %v467_v20, %v466_v19  ;;  %v21_v26 = vld [vmem:[%s696_s4] sm:$0x7]  ;;  %s451_s3 = sshll.u32 %s588_s2, 4  ;;  %s452_s3 = int_to_ptr.vmem [resolvable:$true] %s451_s3 }
   0xa   :  { %v34_v25 = vsub.s32 1, %v33_v24  ;;  %v203_v31 = vsub.s32 0, %v33_v24  ;;  %v118_v37 = vsub.s32 2, %v33_v24  ;;  %s561_s4 = scalar_lea.vmem %s452_s3, 128  ;;  %p566_p1 = scmp.lt.s32.totalorder %s452_s3, %s452_s3 }
   0xb   :  { %501 = vmatmul.mubr.msk.f32.vlgmr.msra.gmra.mrb[0].mxu0 %vm36_vm1, %v26_v13  ;;  %546 = vmatpush3.bf16.msra.mxu1 %v545_v21  ;;  %p562_p0 = scmp.ne.s32.totalorder %s452_s3, %s561_s4  ;;  %p567_p2 = scmp.lt.s32.totalorder %s561_s4, %s561_s4 }
   0xc   :  { %549 = vmatpush3.bf16.msra.mxu0 %v548_v14  ;;  %522 = vmatprep.mubr.msk.f32.mxu0 %vm586_vm0, %v587_v6  ;;  %v35_v27 = vrot.slane %v21_v26, %v34_v25  ;;  %v204_v32 = vrot.slane %v21_v26, %v203_v31  ;;  %v119_v38 = vrot.slane %v21_v26, %v118_v37 }
   0xd   :  { %550 = vmatprep.subr.bf16.mxu0 %v585_v3  ;;  %525 = vmatprep.subr.mxu1 %v587_v6  ;;  %p568_p3 = por %p567_p2, %p566_p1 }
   0xe   :  { %512 = vmatmul.mubr.msk.f32.vlgmr.msra.gmra.mrb[0].mxu1 %vm36_vm1, %v110_v22 }
   0xf   :  { %527 = vmatprep.mubr.msk.f32.mxu1 %vm586_vm0, %v587_v6  ;;  %p569_p4 = pnand %p568_p3, %p562_p0 }
  0x10   :  { %552 = vmatpush3.bf16.msra.mxu0 %v551_v17 }
  0x13   :  { %523 = vmatmul.mubr.msk.f32.vlgmr.msra.gmra.mrb[2].mxu0 %vm36_vm1, %v196_v18 }
  0xde   :  { %v106_v28 = vpop.f32.mrb[0].mxu0 }
  0xdf   :  { %v107_v29 = vadd.f32 %v106_v28, %v35_v27  ;;  %v502_v30 = vpop.f32.mrb[1].mxu0 }
  0xe1   :  { %194 = vst.msk [vmem:[#allocation2] sm:$0xff] %vm193_vm2, %v107_v29  ;;  %v189_v39 = vpop.f32.mrb[0].mxu1 }
  0xe2   :  { %v190_v40 = vadd.f32 %v189_v39, %v119_v38  ;;  %v513_v41 = vpop.f32.mrb[1].mxu1 }
  0xe4   :  { %195 = vst.msk [vmem:[#allocation3] sm:$0xff] %vm193_vm2, %v190_v40 }
  0xe6   :  { %v275_v33 = vpop.f32.mrb[2].mxu0 }
  0xe7   :  { %v524_v34 = vpop.f32.mrb[3].mxu0  ;;  %v276_v35 = vadd.f32 %v275_v33, %v204_v32 }
  0xe8   :  { %v279_v36 = vld [vmem:[#allocation2] sm:$0xff] }
  0xe9   :  { %526 = vmatpush3.xpose.msk.msra.mxu1 %vm193_vm2, %v279_v36 }
  0xea   :  { %530 = vmatprep.subr.mxu1 %v587_v6 }
  0xeb   :  { %v280_v42 = vld [vmem:[#allocation3] sm:$0xff] }
  0xec   :  { %528 = vmatmul.mubr.msk.f32.vlgmr.msra.gmra.mrb[2].mxu1 %vm193_vm2, %v276_v35 }
  0xed   :  { %532 = vmatprep.mubr.msk.f32.mxu1 %vm586_vm0, %v587_v6  ;;  %531 = vmatpush3.msra.mxu1 %v280_v42 }
 0x1bf   :  { %v354_v43 = vpop.f32.mrb[2].mxu1 }
 0x1c0   :  { %v358_v44 = vmul.f32 0.25, %v354_v43  ;;  %v529_v45 = vpop.f32.mrb[3].mxu1 }
 0x1c2   :  { %v360_v46 = vsel %vm359_vm3, %v358_v44, -inf }
 0x1c3   :  { %361 = vmax.xlane.f32.xlu0 %v360_v46 }
 0x250   :  { %v362_v47 = vpop.xlane.xlu0 %361 }
 0x251   :  { %v363_v48 = vsub.f32 %v358_v44, %v362_v47 }
 0x253   :  { %v364_v49 = vmul.f32 1.442695, %v363_v48 }
 0x255   :  { %557 = vpow2.f32 %v364_v49 }
 0x25f   :  { %v558_v50 = vpop.eup %557 }
 0x260   :  { %533 = vmatmul.mubr.msk.f32.vlgmr.msra.gmra.mrb[4].mxu1 %vm359_vm3, %v558_v50  ;;  %v366_v51 = vsel %vm359_vm3, %v558_v50, 0.0 }
 0x261   :  { %367 = vadd.xlane.f32.xlu0 %v366_v51 }
 0x2ee   :  { %v368_v52 = vpop.xlane.xlu0 %367 }
 0x2ef   :  { %559 = vrcp.f32 %v368_v52 }
 0x2f9   :  { %v560_v53 = vpop.eup %559 }
 0x333   :  { %v438_v54 = vpop.f32.mrb[4].mxu1 }
 0x334   :  { %v443_v55 = vmul.f32 %v560_v53, %v438_v54  ;;  %v534_v56 = vpop.f32.mrb[5].mxu1 }
 0x336   :  { %444 = vst.msk [vmem:[#allocation4] sm:$0xff] %vm193_vm2, %v443_v55 }
 0x337   :  { %572 = shalt.err (!%p569_p4)
}
 0x338   :  { %s573_s25 = scalar_lea.hbm %s697_s5, 128 }
 0x339   :  { %p574_p5 = scmp.ne.s32.totalorder %s697_s5, %s573_s25  ;;  %p577_p6 = scmp.lt.u32.totalorder %s573_s25, %s697_s5 }
 0x33b   :  { %p579_p7 = pnand %p577_p6, %p574_p5 }
 0x33d   :  { %582 = shalt.err (!%p579_p7)
}
 0x33e   :  { %454 = dma.vmem_to_hbm [thread:$0]  %s452_s3, 128, %s697_s5, [#allocation5]  }
 0x33f   :  { %583 = dma.done.wait [#allocation5], 128  }
 0x340   :  { %584 = vsyncadd [#allocation5], 4294967168 }
 0x341   :  { %458 = vsyncpa [#allocation5], 1 }

</bundles_post_ra>
